<compile_context>
chip_gen: v5e
topology: v5e:2x2
jax: 0.10.0
libtpu: 0.0.40
codegen_flags: <defaults>
</compile_context>

<pallas_src>
import math

import jax
import jax.numpy as jnp
from jax.experimental import pallas as pl
from jax.experimental.pallas import tpu as pltpu


def _build_pe(max_len: int, d_model: int) -> jnp.ndarray:
    """Deterministically build the sinusoidal positional-encoding buffer,
    matching the PyTorch __init__ exactly. Shape: [1, max_len, d_model]."""
    position = jnp.arange(0, max_len, dtype=jnp.float32)[:, None]          # [L, 1]
    div_term = jnp.exp(
        jnp.arange(0, d_model, 2, dtype=jnp.float32) * (-math.log(10000.0) / d_model)
    )                                                                       # [D/2]
    angles = position * div_term                                            # [L, D/2]
    pe = jnp.zeros((max_len, d_model), dtype=jnp.float32)
    pe = pe.at[:, 0::2].set(jnp.sin(angles))
    pe = pe.at[:, 1::2].set(jnp.cos(angles))
    return pe[None, :, :]                                                   # [1, L, D]


def _pe_add_kernel(x_ref, pe_ref, o_ref):
    # x_ref/o_ref: [TS, B*D] lane-dense tiles; pe_ref: [1, B*D], broadcasts over
    # the sublane (row) axis exactly like the PyTorch broadcast over seq_len.
    o_ref[...] = x_ref[...] + pe_ref[...]


def _choose_tile_s(S: int, row_bytes: int,
                   per_block_budget: int = 4 * 1024 * 1024) -> int:
    """Pick a sublane tile (rows of the [S, B*D] view).

    Keeps each block <= per_block_budget bytes so that the pipeline footprint
    (2 double-buffered blocks for x + 2 for out) stays well under the default
    scoped VMEM on v5e/v6e/v7x, while being as large as possible (>=8-row
    multiples) to amortize per-grid-step overhead and hit the HBM roofline.
    """
    max_rows = max(8, (per_block_budget // max(row_bytes, 1)) // 8 * 8)
    if S <= max_rows:
        return S                     # whole array fits in one block
    return min(max_rows, 1024)       # multiple of 8; partial edge tile is fine


def positional_encoding_forward(x: jnp.ndarray, pe: jnp.ndarray,
                                *, tile_s: int | None = None) -> jnp.ndarray:
    """x: [S, B, D]; pe: [1, max_len, D].  Returns x + pe[:, :B] (dropout = identity)."""
    S, B, D = x.shape
    BD = B * D
    dtype_bytes = jnp.dtype(x.dtype).itemsize

    # pe[:, :x.size(1)] -> static slice by the *batch* size (PyTorch quirk kept),
    # flattened to the same lane-dense [1, B*D] layout as x.
    pe_slice = pe[:, :B, :].astype(x.dtype).reshape(1, BD)                  # [1, B*D]
    x2 = x.reshape(S, BD)                                                   # [S, B*D]

    ts = tile_s if tile_s is not None else _choose_tile_s(S, BD * dtype_bytes)
    grid = (pl.cdiv(S, ts),)

    out2 = pl.pallas_call(
        _pe_add_kernel,
        out_shape=jax.ShapeDtypeStruct((S, BD), x.dtype),
        grid_spec=pltpu.PrefetchScalarGridSpec(
            num_scalar_prefetch=0,
            grid=grid,
            in_specs=[
                # x tile marches down the S axis; double-buffered by Pallas.
                pl.BlockSpec((ts, BD), lambda i: (i, 0)),
                # pe block index is constant -> fetched once, stays VMEM-resident.
                pl.BlockSpec((1, BD), lambda i: (0, 0)),
            ],
            out_specs=pl.BlockSpec((ts, BD), lambda i: (i, 0)),
        ),
        compiler_params=pltpu.CompilerParams(
            # Tiles are independent -> let v7x shard them across its 2 TCs.
            dimension_semantics=("parallel",),
            vmem_limit_bytes=32 * 1024 * 1024,
        ),
        cost_estimate=pl.CostEstimate(
            flops=S * BD,
            transcendentals=0,
            bytes_accessed=(2 * S * BD + BD) * dtype_bytes,
        ),
    )(x2, pe_slice)

    # Dropout: eval/inference mode -> identity.
    return out2.reshape(S, B, D)


if __name__ == "__main__":
    # Small shapes consistent with the module: seq=8, batch=4, d_model=32.
    # (batch*d_model = 128 -> exactly one full lane-width row per sequence step.)
    S, B, D = 8, 4, 32
    max_len = 64          # smaller-than-5000 max_len; semantics unchanged
    dropout_p = 0.1       # unused in inference (identity)

    key = jax.random.PRNGKey(0)
    x = jax.random.normal(key, (S, B, D), dtype=jnp.float32)
    pe = _build_pe(max_len, D)

    out = positional_encoding_forward(x, pe)
    out = jax.block_until_ready(out)

    # Reference check in plain JAX (mirrors the PyTorch forward exactly).
    ref = x + pe[:, :B]
    assert out.shape == (S, B, D)
    assert jnp.allclose(out, ref, atol=1e-6), "mismatch vs reference"

    # Second tiny check that exercises the multi-tile (pipelined) path: S=24,
    # forced 8-row tiles -> grid of 3 steps.
    S2 = 24
    x2 = jax.random.normal(jax.random.PRNGKey(1), (S2, B, D), dtype=jnp.float32)
    out2 = jax.block_until_ready(positional_encoding_forward(x2, pe, tile_s=8))
    ref2 = x2 + pe[:, :B]
    assert jnp.allclose(out2, ref2, atol=1e-6), "mismatch vs reference (tiled path)"

    print("KERNEL_OK")
</pallas_src>

<mosaic_0001>
module attributes {stable_mosaic.version = 11 : i64} {
  func.func @_pe_add_kernel(%arg0: i32, %arg1: memref<8x128xf32, #tpu.memory_space<vmem>>, %arg2: memref<1x128xf32, #tpu.memory_space<vmem>>, %arg3: memref<8x128xf32, #tpu.memory_space<vmem>>) attributes {dimension_semantics = [#tpu.dimension_semantics<parallel>], iteration_bounds = array<i64: 1>, scalar_prefetch = 0 : i64, scratch_operands = 0 : i64, tpu.core_type = #tpu.core_type<tc>, window_params = [{transform_indices = @transform_0, window_bounds = array<i64: 8, 128>}, {pipeline_mode = #tpu.pipeline_mode<synchronous>, transform_indices = @transform_1, window_bounds = array<i64: 1, 128>}, {transform_indices = @transform_2, window_bounds = array<i64: 8, 128>}]} {
    %c0 = arith.constant 0 : index
    %c0_0 = arith.constant 0 : index
    %0 = vector.load %arg1[%c0, %c0_0] : memref<8x128xf32, #tpu.memory_space<vmem>>, vector<8x128xf32>
    %c0_1 = arith.constant 0 : index
    %c0_2 = arith.constant 0 : index
    %1 = vector.load %arg2[%c0_1, %c0_2] : memref<1x128xf32, #tpu.memory_space<vmem>>, vector<1x128xf32>
    %2 = vector.broadcast %1 : vector<1x128xf32> to vector<8x128xf32>
    %3 = arith.addf %0, %2 : vector<8x128xf32>
    %c0_3 = arith.constant 0 : index
    %c0_4 = arith.constant 0 : index
    %4 = vector.load %arg3[%c0_3, %c0_4] : memref<8x128xf32, #tpu.memory_space<vmem>>, vector<8x128xf32>
    tpu.vector_store %arg3[%c0_3, %c0_4], %3 {strides = array<i32>} : memref<8x128xf32, #tpu.memory_space<vmem>>, vector<8x128xf32>,
    return
  }
  func.func @transform_0(%arg0: i32) -> (i32, i32) {
    %c0_i32 = arith.constant 0 : i32
    %c0_i32_0 = arith.constant 0 : i32
    return %arg0, %c0_i32 : i32, i32
  }
  func.func @transform_1(%arg0: i32) -> (i32, i32) {
    %c0_i32 = arith.constant 0 : i32
    %c0_i32_0 = arith.constant 0 : i32
    %c0_i32_1 = arith.constant 0 : i32
    return %c0_i32, %c0_i32_0 : i32, i32
  }
  func.func @transform_2(%arg0: i32) -> (i32, i32) {
    %c0_i32 = arith.constant 0 : i32
    %c0_i32_0 = arith.constant 0 : i32
    return %arg0, %c0_i32 : i32, i32
  }
}

</mosaic_0001>

<bundles_post_ra>
// kernel: tpu_custom_call.1
= control target key start
LH: loop header
LB: loop body
LE: loop exit
PB: predicated region body
PF: predicated region fallthrough
CT: control target
= control target key end

     0   :  { %7 = vsyncpa [#allocation3], 0  ;;  %s174_s0 = inlined_call_operand.hbm [shape: f32[8,128], index: 0, kind: input, shape index: {}]   ;;  %s175_s1 = inlined_call_operand.hbm [shape: f32[1,128], index: 1, kind: input, shape index: {}]   ;;  %s176_s2 = inlined_call_operand.hbm [shape: f32[8,128], index: 2, kind: output, shape index: {}]  }
   0x1   :  { %8 = vsyncpa [#allocation6], 0 }
   0x2   :  { %9 = vsyncpa [#allocation4], 0  ;;  %s15_s11 = sshll.u32 %s174_s0, 4  ;;  %s147_s12 = smov [#allocation2]   ;;  %s16_s11 = int_to_ptr.hbm [resolvable:$true] %s15_s11 }
   0x3   :  { %s17_s13 = sshll.u32 %s147_s12, 4  ;;  %s26_s16 = sshll.u32 %s175_s1, 4  ;;  %s18_s13 = int_to_ptr.vmem [resolvable:$true] %s17_s13  ;;  %s27_s16 = int_to_ptr.hbm [resolvable:$true] %s26_s16 }
   0x4   :  { %20 = dma.hbm_to_vmem [thread:$0]  %s16_s11, 128, %s18_s13, [#allocation3]  }
   0x5   :  { %s148_s17 = smov [#allocation5]  }
   0x6   :  { %s28_s18 = sshll.u32 %s148_s17, 4  ;;  %s29_s18 = int_to_ptr.vmem [resolvable:$true] %s28_s18 }
   0x7   :  { %31 = dma.hbm_to_vmem [thread:$0]  %s27_s16, 16, %s29_s18, [#allocation6]  }
   0x8   :  { %141 = dma.done.wait [#allocation3], 128  }
   0x9   :  { %142 = vsyncadd [#allocation3], 4294967168 }
   0xa   :  { %143 = dma.done.wait [#allocation6], 16  }
   0xb   :  { %144 = vsyncadd [#allocation6], 4294967280  ;;  %s149_s19 = smov [#allocation7]   ;;  %s54_s22 = sshll.u32 %s176_s2, 4  ;;  %v40_v0 = vld [vmem:[#allocation2] sm:$0xff]  ;;  %s55_s22 = int_to_ptr.hbm [resolvable:$true] %s54_s22 }
   0xc   :  { %s52_s0 = sshll.u32 %s149_s19, 4  ;;  %v68_v1 = vld [vmem:[#allocation5] ss:$0 sm:$0xff]  ;;  %s53_s0 = int_to_ptr.vmem [resolvable:$true] %s52_s0 }
   0xd   :  { %v45_v2 = vadd.f32 %v68_v1, %v40_v0 }
   0xf   :  { %46 = vst [vmem:[#allocation7] sm:$0xff] %v45_v2 }
  0x10   :  { %57 = dma.vmem_to_hbm [thread:$0]  %s53_s0, 128, %s55_s22, [#allocation4]  }
  0x11   :  { %145 = dma.done.wait [#allocation4], 128  }
  0x12   :  { %146 = vsyncadd [#allocation4], 4294967168 }
  0x13   :  { %62 = vsyncpa [#allocation3], 1 }
  0x14   :  { %63 = vsyncpa [#allocation6], 1 }
  0x15   :  { %64 = vsyncpa [#allocation4], 1 }

</bundles_post_ra>
